<compile_context>
chip_gen: v5e
topology: v5e:2x2
jax: 0.10.0
libtpu: 0.0.40
codegen_flags: <defaults>
</compile_context>

<pallas_src>
import jax
import jax.numpy as jnp
from jax.experimental import pallas as pl
from jax.experimental.pallas import tpu as pltpu


def _cdiv(a, b):
    return -(-a // b)


def _round_up(a, m):
    return _cdiv(a, m) * m


def _vmem_limit_bytes():
    """Generation-aware scoped-VMEM limit: ~3/4 of physical VMEM.

    v5e/v6e (128 MiB physical) -> ~96 MiB; v7x (64 MiB physical) -> ~48 MiB.
    Falls back to a conservative 48 MiB if the hardware query is unavailable.
    """
    cap = 64 << 20
    try:
        info = pltpu.get_tpu_info()
        cap = int(getattr(info, "vmem_capacity_bytes", cap))
    except Exception:
        pass
    return min((cap * 3) // 4, 100 << 20)


# ---------------------------------------------------------------------------
# Kernel: one batch tile of the projection.
# ---------------------------------------------------------------------------
def dino_embed_kernel(x_ref, w_ref, b_ref, o_ref):
    # x: (TB, K) f32, w: (K, N) bf16, b: (1, N) f32, o: (TB, N) f32
    x = x_ref[...].astype(jnp.bfloat16)
    acc = jnp.dot(x, w_ref[...], preferred_element_type=jnp.float32)
    o_ref[...] = (acc + b_ref[...]).astype(o_ref.dtype)


# ---------------------------------------------------------------------------
# Wrapper: tiling + the `.unsqueeze(1)` semantics (no pad/slice HBM passes).
# ---------------------------------------------------------------------------
def dino_image_embedding_pallas(x, w, b, *, tb=512):
    """x: (B, dino_dim) f32; w: (dino_dim, d_model) bf16 (pre-transposed);
    b: (d_model,) f32.  Returns (B, 1, d_model) f32."""
    B, K = x.shape
    Kw, N = w.shape
    assert K == Kw, (K, Kw)

    # Batch tile selection:
    #  * B <= 8: single full-array block (exempt from the (8,128) rule).
    #  * otherwise: at least 2 tiles (so v7x can shard the "parallel" axis
    #    across both TensorCores), capped at `tb`, multiple of 8.
    if B <= 8:
        TB = B
    else:
        TB = min(tb, _round_up(_cdiv(B, 2), 8))
    grid = (_cdiv(B, TB),)

    b2d = b.reshape(1, N)

    cost = pl.CostEstimate(
        flops=2 * B * K * N,
        transcendentals=0,
        bytes_accessed=(B * K * x.dtype.itemsize      # activations read
                        + K * N * w.dtype.itemsize    # weight read (once)
                        + N * 4                       # bias read
                        + B * N * 4),                 # output write
    )

    out = pl.pallas_call(
        dino_embed_kernel,
        out_shape=jax.ShapeDtypeStruct((B, N), jnp.float32),
        grid=grid,
        in_specs=[
            # activations: tiled over batch (last block masked if B % TB != 0)
            pl.BlockSpec((TB, K), lambda i: (i, 0)),
            # weight: constant block -> VMEM-resident; single-buffered
            pl.BlockSpec((K, N), lambda i: (0, 0),
                         pipeline_mode=pl.Buffered(1)),
            # bias: constant block; single-buffered
            pl.BlockSpec((1, N), lambda i: (0, 0),
                         pipeline_mode=pl.Buffered(1)),
        ],
        out_specs=pl.BlockSpec((TB, N), lambda i: (i, 0)),
        compiler_params=pltpu.CompilerParams(
            dimension_semantics=("parallel",),         # shard batch tiles across TCs
            vmem_limit_bytes=_vmem_limit_bytes()),
        cost_estimate=cost,
    )(x, w, b2d)

    # Apply the module's `.unsqueeze(1)` (metadata-only reshape, no HBM pass).
    return out.reshape(B, 1, N)


# ---------------------------------------------------------------------------
# Deterministic parameter init (shapes match nn.Linear(dino_dim, d_model)).
# ---------------------------------------------------------------------------
def init_params(key, dino_dim, d_model):
    kw, kb = jax.random.split(key)
    bound = 1.0 / (dino_dim ** 0.5)                    # PyTorch Linear default init range
    # Stored pre-transposed (dino_dim, d_model) and in bf16 for MXU / DMA efficiency.
    w_t = jax.random.uniform(kw, (dino_dim, d_model), jnp.float32, -bound, bound)
    bias = jax.random.uniform(kb, (d_model,), jnp.float32, -bound, bound)
    return w_t.astype(jnp.bfloat16), bias


# ---------------------------------------------------------------------------
# Pure-JAX references for validation.
# ---------------------------------------------------------------------------
def ref_forward_mxu_precision(x, w_bf16, b):
    # Mirrors the kernel's operand precision (bf16 operands, f32 accumulate).
    y = x.astype(jnp.bfloat16).astype(jnp.float32) @ w_bf16.astype(jnp.float32) + b
    return y[:, None, :]                               # unsqueeze(1)


def ref_forward_f32(x, w_bf16, b):
    # Full-f32 PyTorch-Linear-style reference (loose sanity check only).
    y = x @ w_bf16.astype(jnp.float32) + b
    return y[:, None, :]


# ---------------------------------------------------------------------------
if __name__ == "__main__":
    # Small shapes: B deliberately not tile-aligned (exercises the masked
    # partial final block), d_model a multiple of 128 (lane-dense stores).
    B, dino_dim, d_model = 10, 256, 128

    key = jax.random.PRNGKey(0)
    kx, kp = jax.random.split(key)
    x = jax.random.normal(kx, (B, dino_dim), jnp.float32)
    w_bf16, bias = init_params(kp, dino_dim, d_model)

    out = dino_image_embedding_pallas(x, w_bf16, bias)
    out = jax.block_until_ready(out)
    assert out.shape == (B, 1, d_model), out.shape

    # Tight check against a reference with matching MXU operand precision.
    ref = ref_forward_mxu_precision(x, w_bf16, bias)
    max_err = float(jnp.max(jnp.abs(out - ref)))
    assert max_err < 2e-3, max_err

    # Loose sanity check against the full-f32 Linear semantics.
    ref_f32 = ref_forward_f32(x, w_bf16, bias)
    max_err_f32 = float(jnp.max(jnp.abs(out - ref_f32)))
    assert max_err_f32 < 1e-1, max_err_f32

    print("KERNEL_OK")
</pallas_src>

<mosaic_0001>
module attributes {stable_mosaic.version = 11 : i64} {
  func.func @dino_embed_kernel(%arg0: i32, %arg1: memref<8x256xf32, #tpu.memory_space<vmem>>, %arg2: memref<256x128xbf16, #tpu.memory_space<vmem>>, %arg3: memref<1x128xf32, #tpu.memory_space<vmem>>, %arg4: memref<8x128xf32, #tpu.memory_space<vmem>>) attributes {dimension_semantics = [#tpu.dimension_semantics<parallel>], iteration_bounds = array<i64: 2>, scalar_prefetch = 0 : i64, scratch_operands = 0 : i64, tpu.core_type = #tpu.core_type<tc>, window_params = [{transform_indices = @transform_0, window_bounds = array<i64: 8, 256>}, {pipeline_mode = #tpu.pipeline_mode<synchronous>, transform_indices = @transform_1, window_bounds = array<i64: 256, 128>}, {pipeline_mode = #tpu.pipeline_mode<synchronous>, transform_indices = @transform_2, window_bounds = array<i64: 1, 128>}, {transform_indices = @transform_3, window_bounds = array<i64: 8, 128>}]} {
    %c0 = arith.constant 0 : index
    %c0_0 = arith.constant 0 : index
    %0 = vector.load %arg1[%c0, %c0_0] : memref<8x256xf32, #tpu.memory_space<vmem>>, vector<8x256xf32>
    %1 = arith.truncf %0 : vector<8x256xf32> to vector<8x256xbf16>
    %c0_1 = arith.constant 0 : index
    %c0_2 = arith.constant 0 : index
    %2 = vector.load %arg2[%c0_1, %c0_2] : memref<256x128xbf16, #tpu.memory_space<vmem>>, vector<256x128xbf16>
    %cst = arith.constant dense<0.000000e+00> : vector<8x128xf32>
    %3 = tpu.matmul %1, %2, %cst {dimension_numbers = #tpu.dot_dimension_numbers<[1], [0], [0], [1], [0, 0, 1, 1], [], []>} : vector<8x256xbf16>, vector<256x128xbf16>, vector<8x128xf32> -> vector<8x128xf32>
    %c0_3 = arith.constant 0 : index
    %c0_4 = arith.constant 0 : index
    %4 = vector.load %arg3[%c0_3, %c0_4] : memref<1x128xf32, #tpu.memory_space<vmem>>, vector<1x128xf32>
    %5 = vector.broadcast %4 : vector<1x128xf32> to vector<8x128xf32>
    %6 = arith.addf %3, %5 : vector<8x128xf32>
    %c0_5 = arith.constant 0 : index
    %c0_6 = arith.constant 0 : index
    %7 = vector.load %arg4[%c0_5, %c0_6] : memref<8x128xf32, #tpu.memory_space<vmem>>, vector<8x128xf32>
    tpu.vector_store %arg4[%c0_5, %c0_6], %6 {strides = array<i32>} : memref<8x128xf32, #tpu.memory_space<vmem>>, vector<8x128xf32>,
    return
  }
  func.func @transform_0(%arg0: i32) -> (i32, i32) {
    %c0_i32 = arith.constant 0 : i32
    %c0_i32_0 = arith.constant 0 : i32
    return %arg0, %c0_i32 : i32, i32
  }
  func.func @transform_1(%arg0: i32) -> (i32, i32) {
    %c0_i32 = arith.constant 0 : i32
    %c0_i32_0 = arith.constant 0 : i32
    %c0_i32_1 = arith.constant 0 : i32
    return %c0_i32, %c0_i32_0 : i32, i32
  }
  func.func @transform_2(%arg0: i32) -> (i32, i32) {
    %c0_i32 = arith.constant 0 : i32
    %c0_i32_0 = arith.constant 0 : i32
    %c0_i32_1 = arith.constant 0 : i32
    return %c0_i32, %c0_i32_0 : i32, i32
  }
  func.func @transform_3(%arg0: i32) -> (i32, i32) {
    %c0_i32 = arith.constant 0 : i32
    %c0_i32_0 = arith.constant 0 : i32
    return %arg0, %c0_i32 : i32, i32
  }
}

</mosaic_0001>

<bundles_post_ra>
// kernel: tpu_custom_call.1
= control target key start
LH: loop header
LB: loop body
LE: loop exit
PB: predicated region body
PF: predicated region fallthrough
CT: control target
= control target key end

     0   :  { %8 = vsyncpa [#allocation3], 0  ;;  %s920_s0 = inlined_call_operand.hbm [shape: f32[10,256], index: 0, kind: input, shape index: {}]   ;;  %s921_s1 = inlined_call_operand.hbm [shape: bf16[256,128], index: 1, kind: input, shape index: {}]   ;;  %s922_s2 = inlined_call_operand.vmem [shape: f32[1,128], index: 2, kind: input, shape index: {}]   ;;  %s923_s3 = inlined_call_operand.hbm [shape: f32[10,128], index: 3, kind: output, shape index: {}]  }
   0x1   :  { %10 = vsyncpa [#allocation3 + $0x1], 0 }
   0x2   :  { %11 = vsyncpa [#allocation6], 0 }
   0x3   :  { %12 = vsyncpa [#allocation4], 0 }
   0x4   :  { %14 = vsyncpa [#allocation4 + $0x1], 0  ;;  %s776_s12 = smov 0   ;;  %s778_s13 = smov 0  }
   0x5   :  { %s780_s14 = smov 0   ;;  %s782_s15 = smov 0  }
   0x6 LB: > { %s130_s18 = sshll.u32 %s921_s1, 4  ;;  %s800_s19 = sadd.s32 4294967295, %s751_s15   ;;  %s751_s15 = sphi %s782_s15, %s933_s15   ;;  %s747_s14 = sphi %s780_s14, %s932_s14   ;;  %s743_s13 = sphi %s778_s13, %s931_s13   ;;  %s739_s12 = sphi %s776_s12, %s930_s12   ;;  %s131_s18 = int_to_ptr.hbm [resolvable:$true] %s130_s18 }
   0x7   : > { %p466_p0 = scmp.ge.s32.totalorder %s751_s15, 1  ;;  %p41_p1 = scmp.eq.s32.totalorder %s800_s19, 0 }
   0x8   : > { %p119_p2 = scmp.lt.s32.totalorder %s751_s15, 3  ;;  %s753_s21 = smov [#allocation5]  }
   0x9   : > { %s132_s22 = sshll.u32 %s753_s21, 4  ;;  %s754_s23 = smov 64   ;;  %s133_s22 = int_to_ptr.vmem [resolvable:$true] %s132_s22 }
   0xa   : > { %p805_p3 = pnand %p466_p0, %p119_p2  ;;  %s755_s24 = smov 4  }
   0xb   : > { %s465_s25 = sadd.s32 4294967294, %s751_s15   ;;  %s816_s26 = sadd.s32 1, %s751_s15  }
   0xc   : > { %p569_p4 = pneg %p805_p3  ;;  %s27_s27 = sadd.s32 1, %s747_s14 }
   0xd   : > { %s24_s28 = ssub.s32 %s751_s15, %s816_s26  ;;  %p34_p7 = scmp.ne.s32.totalorder %s747_s14, %s743_s13 }
   0xe   : > { %p570_p6 = pnand %p569_p4, %p41_p1  ;;  %p25_p8 = scmp.eq.s32.totalorder %s24_s28, 0 }
   0xf   : > { %p35_p9 = scmp.eq.s32.totalorder %s751_s15, 0  ;;  %p40_p10 = scmp.ne.s32.totalorder %s743_s13, %s739_s12 }
  0x10   : > { %572 = dma.hbm_to_vmem [thread:$0]  (!%p570_p6), %s131_s18, 2048, %s133_s22, [#allocation6], %s754_s23, %s754_s23, %s755_s24  }
  0x11   : > { %p106_p11 = scmp.eq.s32.totalorder %s800_s19, 1  ;;  %p832_p12 = por %p41_p1, %p40_p10 }
  0x12   : > { %s828_s29 = scalar_select %p25_p8, %s747_s14, %s27_s27  }
  0x13   : > { %p836_p13 = por %p106_p11, %p34_p7  ;;  %p112_p0 = scmp.eq.s32.totalorder %s465_s25, 1 }
  0x14   : > { %p36_p2 = por %p35_p9, %p34_p7  ;;  %s149_s5 = sand.u32 1, %s747_s14  }
  0x15   : > { %p841_p4 = por %p112_p0, %p40_p10  ;;  %p582_p6 = scmp.lt.s32.totalorder %s751_s15, 2 }
  0x16   : > { %s469_s7 = sshll.u32 %s149_s5, 4  ;;  %s544_s8 = sshll.u32 %s751_s15, 4 }
  0x17   : > { %s158_s11 = scalar_lea.hbm %s920_s0, %s544_s8  ;;  %s153_s17 = scalar_lea.vmem [#allocation2], %s469_s7 }
  0x18   : > { %s160_s16 = sshll.u32 %s158_s11, 4  ;;  %s162_s18 = sshll.u32 %s153_s17, 4  ;;  %s161_s16 = int_to_ptr.hbm [resolvable:$true] %s160_s16  ;;  %s163_s18 = int_to_ptr.vmem [resolvable:$true] %s162_s18 }
  0x19   : > { %p850_p8 = pnand %p582_p6, %p36_p2  ;;  %s150_s22 = scalar_lea.sflag [#allocation3], %s149_s5 }
  0x1a   : > { %s651_s23 = sshra.s32 %s161_s16, 4  ;;  %s658_s28 = scalar_lea.hbm %s920_s0, 32  ;;  %s652_s23 = int_to_ptr.hbm [resolvable:$true] %s651_s23 }
  0x1b   : > { %s653_s24 = scalar_lea.hbm %s652_s23, 16  ;;  %p655_p9 = pneg %p850_p8 }
  0x1c   : > { %p654_p7 = scmp.ne.s32.totalorder %s652_s23, %s653_s24  ;;  %p659_p0 = scmp.lt.s32.totalorder %s652_s23, %s920_s0 }
  0x1d   : > { %p660_p2 = scmp.lt.s32.totalorder %s658_s28, %s653_s24 }
  0x1e   : > { %p656_p10 = pnand %p655_p9, %p654_p7 }
  0x1f   : > { %p661_p6 = por %p660_p2, %p659_p0 }
  0x20   : > { %p657_p11 = pneg %p656_p10 }
  0x22   : > { %p662_p5 = pnand %p661_p6, %p657_p11 }
  0x24   : > { %665 = shalt.err (!%p662_p5)
}
  0x25   : > { %576 = dma.hbm_to_vmem [thread:$0]  (!%p850_p8), %s161_s16, 256, %s163_s18, %s150_s22  }
  0x26   : > { %171 = sbr.rel (%p805_p3) target bundleno = 213 (0xd5), region = 32  ;;  %s867_s5 = sand.u32 (!%p805_p3), 1, %s743_s13  }
  0x27   : > { %s473_s9 = sshll.u32 (!%p805_p3), %s867_s5, 4  ;;  %s174_s10 = scalar_lea.sflag (!%p805_p3), [#allocation3], %s867_s5 }
  0x28   : > { %s871_s11 = scalar_lea.vmem (!%p805_p3), [#allocation2], %s473_s9 }
  0x2b   : > { %726 = dma.done.wait (%p832_p12), %s174_s10, 256  }
  0x2c   : > { %728 = vsyncadd (%p832_p12), %s174_s10, 4294967040 }
  0x2d   : > { %730 = dma.done.wait (%p41_p1), [#allocation6], 2048  }
  0x2e   : > { %732 = vsyncadd (%p41_p1), [#allocation6], 4294965248  ;;  %v552_v0 = vld [vmem:[#allocation5 + $0x38] sm:$0xff]  ;;  %v551_v2 = vld [vmem:[#allocation5 + $0x30] sm:$0xff]  ;;  %s475_s20 = sshll.u32 %s867_s5, 3  ;;  %s541_s30 = sshll.u32 %s800_s19, 3 }
  0x2f   : > { %v560_v1 = vld [vmem:[#allocation5 + $0x78] sm:$0xff]  ;;  %342 = vmatpush.bf16.msra.mxu0 %v552_v0  ;;  %v559_v3 = vld [vmem:[#allocation5 + $0x70] sm:$0xff]  ;;  %v550_v4 = vld [vmem:[#allocation5 + $0x28] sm:$0xff]  ;;  %s380_s22 = scalar_lea.hbm %s923_s3, %s541_s30  ;;  %s205_s23 = scalar_lea.vmem [#allocation7], %s475_s20 }
  0x30   : > { %355 = vmatpush.bf16.msra.mxu1 %v560_v1  ;;  %v558_v5 = vld [vmem:[#allocation5 + $0x68] sm:$0xff]  ;;  %v549_v6 = vld [vmem:[#allocation5 + $0x20] sm:$0xff]  ;;  %v548_v8 = vld [vmem:[#allocation5 + $0x18] sm:$0xff]  ;;  %s382_s24 = sshll.u32 %s205_s23, 4  ;;  %s384_s25 = sshll.u32 %s380_s22, 4  ;;  %s383_s24 = int_to_ptr.vmem [resolvable:$true] %s382_s24  ;;  %s385_s25 = int_to_ptr.hbm [resolvable:$true] %s384_s25 }
  0x31   : > { %v557_v7 = vld [vmem:[#allocation5 + $0x60] sm:$0xff]  ;;  %v556_v9 = vld [vmem:[#allocation5 + $0x58] sm:$0xff]  ;;  %v547_v10 = vld [vmem:[#allocation5 + $0x10] sm:$0xff]  ;;  %s370_s19 = scalar_lea.sflag [#allocation4], %s867_s5  ;;  %s695_s27 = sshra.s32 %s385_s25, 4  ;;  %s696_s27 = int_to_ptr.hbm [resolvable:$true] %s695_s27 }
  0x32   : > { %v555_v11 = vld [vmem:[#allocation5 + $0x50] sm:$0xff]  ;;  %v546_v12 = vld [vmem:[#allocation5 + $0x8] sm:$0xff]  ;;  %v545_v14 = vld [vmem:[#allocation5] sm:$0xff]  ;;  %s697_s28 = scalar_lea.hbm %s696_s27, 8  ;;  %s701_s9 = scalar_lea.hbm %s923_s3, 16 }
  0x33   : > { %343 = vmatpush.bf16.msra.mxu0 %v551_v2  ;;  %v554_v13 = vld [vmem:[#allocation5 + $0x48] sm:$0xff]  ;;  %v553_v15 = vld [vmem:[#allocation5 + $0x40] sm:$0xff]  ;;  %p698_p1 = scmp.ne.s32.totalorder %s696_s27, %s697_s28  ;;  %p702_p12 = scmp.lt.s32.totalorder %s696_s27, %s923_s3 }
  0x34   : > { %356 = vmatpush.bf16.msra.mxu1 %v559_v3  ;;  %v206_v16 = vld [vmem:[%s871_s11] sm:$0xff]  ;;  %v207_v17 = vld [vmem:[%s871_s11 + $0x8] sm:$0xff]  ;;  %p703_p8 = scmp.lt.s32.totalorder %s701_s9, %s697_s28 }
  0x35   : > { %v208_v18 = vpack.c.bf16 %v206_v16, %v206_v16  ;;  %v209_v19 = vpack.c.bf16 %v207_v17, %v207_v17  ;;  %v620_v20 = vld [vmem:[%s922_s2] ss:$0 sm:$0xff]  ;;  %p699_p3 = pnand %p698_p1, %p836_p13 }
  0x36   : > { %p704_p7 = por %p703_p8, %p702_p12 }
  0x37   : > { %344 = vmatpush.bf16.msra.mxu0 %v550_v4  ;;  %p700_p5 = pneg %p699_p3 }
  0x38   : > { %357 = vmatpush.bf16.msra.mxu1 %v558_v5 }
  0x39   : > { %p705_p9 = pnand %p704_p7, %p700_p5 }
  0x3b   : > { %345 = vmatpush.bf16.msra.mxu0 %v549_v6 }
  0x3c   : > { %358 = vmatpush.bf16.msra.mxu1 %v557_v7 }
  0x3f   : > { %346 = vmatpush.bf16.msra.mxu0 %v548_v8 }
  0x40   : > { %359 = vmatpush.bf16.msra.mxu1 %v556_v9 }
  0x43   : > { %347 = vmatpush.bf16.msra.mxu0 %v547_v10 }
  0x44   : > { %360 = vmatpush.bf16.msra.mxu1 %v555_v11 }
  0x47   : > { %348 = vmatpush.bf16.msra.mxu0 %v546_v12 }
  0x48   : > { %361 = vmatpush.bf16.msra.mxu1 %v554_v13 }
  0x4b   : > { %349 = vmatpush.bf16.msra.mxu0 %v545_v14 }
  0x4c   : > { %362 = vmatpush.bf16.msra.mxu1 %v553_v15 }
  0x4e   : > { %350 = vmatmul.bf16.vlgmr.msra.gmra.mxu0 %v208_v18 }
  0x4f   : > { %363 = vmatmul.bf16.vlgmr.msra.gmra.mxu1 %v209_v19 }
  0xcb   : > { %v351_v21 = vpop.f32.mrf.mxu0 }
  0xcc   : > { %v364_v22 = vpop.f32.mrf.mxu1  ;;  %v352_v23 = vadd.f32 %v620_v20, %v351_v21 }
  0xce   : > { %v365_v24 = vadd.f32 %v364_v22, %v352_v23 }
  0xd0   : > { %368 = vst [vmem:[%s205_s23] sm:$0xff] %v365_v24 }
  0xd1   : > { %708 = shalt.err (!%p705_p9)
}
  0xd2   : > { %567 = dma.vmem_to_hbm [thread:$0]  (%p836_p13), %s383_s24, 128, %s385_s25, %s370_s19  }
  0xd3   : > { %v353_v25 = vpop.f32.mrf.mxu0 }
  0xd4   : > { %v366_v26 = vpop.f32.mrf.mxu1 }
  0xd5 PF: > { %s396_s5 = sand.u32 1, %s739_s12   ;;  %p929_p10 = scmp.ge.s32.totalorder %s751_s15, 2 }
  0xd6   : > { %s397_s20 = scalar_lea.sflag [#allocation4], %s396_s5 }
  0xd7   : > { %p578_p11 = pnand %p929_p10, %p841_p4 }
  0xd9   : > { %p579_p0 = pneg %p578_p11 }
  0xdb   : > { %734 = dma.done.wait (%p579_p0), %s397_s20, 128  }
  0xdc   : > { %736 = vsyncadd (%p579_p0), %s397_s20, 4294967168  ;;  %p17_p13 = scmp.ge.s32.totalorder %s816_s26, 4   ;;  %s930_s12 = smov %s743_s13 }
  0xdd   : > { %s931_s13 = smov %s747_s14  ;;  %s932_s14 = smov %s828_s29 }
  0xde   : > { %s933_s15 = smov %s816_s26  ;;  %19 = sbr.rel (!%p17_p13) target bundleno = 6 (0x6), region = 81 }
  0xe3   :  { %403 = vsyncpa [#allocation3], 1 }
  0xe4   :  { %405 = vsyncpa [#allocation3 + $0x1], 1 }
  0xe5   :  { %406 = vsyncpa [#allocation6], 1 }
  0xe6   :  { %407 = vsyncpa [#allocation4], 1 }
  0xe7   :  { %409 = vsyncpa [#allocation4 + $0x1], 1 }

</bundles_post_ra>
